<compile_context>
chip_gen: v5e
topology: v5e:2x2
jax: 0.10.0
libtpu: 0.0.40
codegen_flags: <defaults>
</compile_context>

<pallas_src>
import functools

import jax
import jax.numpy as jnp
from jax.experimental import pallas as pl
from jax.experimental.pallas import tpu as pltpu


class Expression:
    """JAX port of the PyTorch Expression module: wraps an arbitrary func."""

    def __init__(self, func):
        self.func = func

    def __call__(self, x):
        return self.func(x)


# --------------------------------------------------------------------------
# Kernels
# --------------------------------------------------------------------------

def _gap_single_kernel(x_ref, o_ref, *, inv_cols):
    """Fast path: the whole H*W row is resident -> mean in one shot.

    Block col extent equals the full array extent, so no OOB columns exist and
    no masking is needed.  One cross-lane reduce + one multiply per row tile.
    """
    xs = x_ref[...].astype(jnp.float32)
    o_ref[...] = (jnp.sum(xs, axis=-1, keepdims=True) * inv_cols).astype(o_ref.dtype)


def _gap_tiled_kernel(x_ref, o_ref, acc_ref, *, inv_cols, cols, tc, needs_mask):
    """Tiled path: 2-D grid (row tiles x col tiles), col (reduction) axis last.

    acc_ref is a lane-dense (tr, 128) f32 accumulator: the steady state is pure
    128-lane VALU adds (hidden under the DMA stream); the cross-lane reduce and
    the masked 1-lane store happen once per row tile in the finalize epilogue.
    Ragged column tails are masked against the true `cols` (no jnp.pad).
    """
    k = pl.program_id(1)

    @pl.when(k == 0)
    def _init():
        acc_ref[...] = jnp.zeros_like(acc_ref)

    xs = x_ref[...].astype(jnp.float32)
    if needs_mask:
        lane = jax.lax.broadcasted_iota(jnp.int32, xs.shape, 1)
        xs = jnp.where(k * tc + lane < cols, xs, 0.0)

    # Fold the (tr, tc) tile into (tr, 128) with static 128-lane slices
    # (pure elementwise adds; no per-step XLU cross-lane reduction).
    partial = xs[:, 0:128]
    for j in range(1, tc // 128):
        partial = partial + xs[:, j * 128:(j + 1) * 128]
    acc_ref[...] += partial

    @pl.when(k == pl.num_programs(1) - 1)
    def _finalize():
        o_ref[...] = (
            jnp.sum(acc_ref[...], axis=-1, keepdims=True) * inv_cols
        ).astype(o_ref.dtype)


# --------------------------------------------------------------------------
# Wrapper
# --------------------------------------------------------------------------

def _cdiv(a, b):
    return (a + b - 1) // b


def _round_up(x, m):
    return ((x + m - 1) // m) * m


def _sublane_multiple(dtype):
    # f32 -> 8, bf16/f16 -> 16, int8/fp8 -> 32 (sub-32-bit dtypes pack sublanes).
    itemsize = jnp.dtype(dtype).itemsize
    return max(8, 32 // max(1, itemsize))


def _vmem_budgets(block_bytes_override=None):
    """Per-input-block byte budget + scoped-VMEM limit, sized for the chip."""
    try:
        cap = int(pltpu.get_tpu_info().vmem_capacity_bytes)
    except Exception:
        cap = 64 << 20  # conservative (v7x-sized) fallback
    # ~16 MiB blocks on 128 MiB-VMEM chips (v5e/v6e), ~8 MiB on v7x (64 MiB).
    block_bytes = min(16 << 20, max(4 << 20, cap // 8))
    if block_bytes_override is not None:
        block_bytes = int(block_bytes_override)
    # 2x double-buffered input block + output/scratch headroom, capped well
    # below physical VMEM (important on v7x's 64 MiB per TensorCore).
    vmem_limit = max(32 << 20, min(cap * 3 // 4, 2 * block_bytes + (16 << 20)))
    return block_bytes, vmem_limit


def global_avg_pool_nchw(x, *, tile_r=1024, block_bytes=None,
                         min_pallas_elems=1 << 20):
    """x: (N, C, H, W) -> (N, C), equivalent to torch x.mean(dim=(2, 3))."""
    N, C, H, W = x.shape
    rows, cols = N * C, H * W
    if rows == 0 or cols == 0:
        return jnp.zeros((N, C), x.dtype)

    # Tiny inputs: per-call / per-step overhead dwarfs the HBM traffic; let XLA
    # fuse the reduce into surrounding ops instead.
    if rows * cols < min_pallas_elems:
        return jnp.mean(x, axis=(2, 3))

    x2 = x.reshape(rows, cols)  # reduction axis is the lane-major last axis
    itemsize = jnp.dtype(x.dtype).itemsize
    sublane = _sublane_multiple(x.dtype)
    block_budget, vmem_limit = _vmem_budgets(block_bytes)

    cols_lanes = _round_up(cols, 128)
    inv_cols = 1.0 / cols

    # Row tile: sublane-aligned, large enough to amortize ~0.35us/step, but
    # guaranteeing >=2 row blocks when possible so the "parallel" axis shards
    # across both v7x TensorCores.
    if rows <= sublane:
        tr_target = rows
    else:
        tr_target = max(sublane, min(tile_r, _round_up(_cdiv(rows, 2), sublane)))

    out_shape = jax.ShapeDtypeStruct((rows, 1), x.dtype)
    cost = pl.CostEstimate(
        flops=rows * cols,
        transcendentals=0,
        bytes_accessed=rows * cols * itemsize + rows * itemsize,
    )

    if cols_lanes * itemsize * sublane <= block_budget:
        # ---- Fast path: a full (lane-padded) row fits in one block. --------
        # 1-D grid over row tiles; no scratch accumulator, no init/finalize.
        max_tr = max(sublane,
                     (block_budget // (cols_lanes * itemsize)) // sublane * sublane)
        tr = min(tr_target, max_tr)
        if tr >= rows:
            tr = rows  # single ragged-free block covering all rows
        grid = (_cdiv(rows, tr),)

        out = pl.pallas_call(
            functools.partial(_gap_single_kernel, inv_cols=inv_cols),
            out_shape=out_shape,
            grid_spec=pltpu.PrefetchScalarGridSpec(
                num_scalar_prefetch=0,
                grid=grid,
                in_specs=[pl.BlockSpec((tr, cols), lambda i: (i, 0))],
                out_specs=pl.BlockSpec((tr, 1), lambda i: (i, 0)),
            ),
            compiler_params=pltpu.CompilerParams(
                dimension_semantics=("parallel",),
                vmem_limit_bytes=vmem_limit,
            ),
            cost_estimate=cost,
        )(x2)
    else:
        # ---- Tiled-reduction path for very large H*W. -----------------------
        tr = tr_target
        max_tc = max(128, (block_budget // (tr * itemsize)) // 128 * 128)
        nk = _cdiv(cols, max_tc)
        tc = _round_up(_cdiv(cols, nk), 128)   # minimize last-tile waste
        nk = _cdiv(cols, tc)
        needs_mask = (cols % tc) != 0
        grid = (_cdiv(rows, tr), nk)

        out = pl.pallas_call(
            functools.partial(_gap_tiled_kernel, inv_cols=inv_cols, cols=cols,
                              tc=tc, needs_mask=needs_mask),
            out_shape=out_shape,
            grid_spec=pltpu.PrefetchScalarGridSpec(
                num_scalar_prefetch=0,
                grid=grid,
                in_specs=[pl.BlockSpec((tr, tc), lambda i, k: (i, k))],
                out_specs=pl.BlockSpec((tr, 1), lambda i, k: (i, 0)),
                scratch_shapes=[pltpu.VMEM((tr, 128), jnp.float32)],
            ),
            compiler_params=pltpu.CompilerParams(
                # Row tiles independent (megacore-shardable); reduction axis
                # sequential and last.
                dimension_semantics=("parallel", "arbitrary"),
                vmem_limit_bytes=vmem_limit,
            ),
            cost_estimate=cost,
        )(x2)

    # Ragged last row block writes junk beyond `rows`; those rows are dropped
    # by Pallas' OOB-write masking and never read here.
    return out[:, 0].reshape(N, C)


if __name__ == "__main__":
    key = jax.random.PRNGKey(0)
    k1, k2 = jax.random.split(key)

    # Force the Pallas path even at these tiny shapes so the kernel itself is
    # exercised (the default threshold would route them to a fused jnp.mean).
    expr = Expression(functools.partial(global_avg_pool_nchw, min_pallas_elems=0))

    # Path 1: single-block-per-row fast path (MNIST-style feature map).
    x1 = jax.random.normal(k1, (2, 4, 16, 16), dtype=jnp.float32)
    y1 = jax.block_until_ready(expr(x1))
    ref1 = x1.mean(axis=(2, 3))
    assert y1.shape == (2, 4)
    assert jnp.allclose(y1, ref1, atol=1e-5, rtol=1e-5)

    # Path 2: tiled-reduction path with ragged row AND column tiles, forced by a
    # tiny per-block budget so the in-kernel masking/accumulation is exercised.
    x2 = jax.random.normal(k2, (2, 5, 10, 30), dtype=jnp.float32)
    y2 = jax.block_until_ready(
        global_avg_pool_nchw(x2, min_pallas_elems=0, block_bytes=8 * 128 * 4))
    ref2 = x2.mean(axis=(2, 3))
    assert y2.shape == (2, 5)
    assert jnp.allclose(y2, ref2, atol=1e-5, rtol=1e-5)

    print("KERNEL_OK")
</pallas_src>

<mosaic_0001>
module attributes {stable_mosaic.version = 11 : i64} {
  func.func @_gap_single_kernel(%arg0: i32, %arg1: memref<8x256xf32, #tpu.memory_space<vmem>>, %arg2: memref<8x1xf32, #tpu.memory_space<vmem>>) attributes {dimension_semantics = [#tpu.dimension_semantics<parallel>], iteration_bounds = array<i64: 1>, scalar_prefetch = 0 : i64, scratch_operands = 0 : i64, tpu.core_type = #tpu.core_type<tc>, window_params = [{transform_indices = @transform_0, window_bounds = array<i64: 8, 256>}, {transform_indices = @transform_1, window_bounds = array<i64: 8, 1>}]} {
    %c0 = arith.constant 0 : index
    %c0_0 = arith.constant 0 : index
    %0 = vector.load %arg1[%c0, %c0_0] : memref<8x256xf32, #tpu.memory_space<vmem>>, vector<8x256xf32>
    %cst = arith.constant dense<0.000000e+00> : vector<8xf32>
    %1 = vector.multi_reduction <add>, %0, %cst [1] : vector<8x256xf32> to vector<8xf32>
    %2 = vector.shape_cast %1 : vector<8xf32> to vector<8x1xf32>
    %cst_1 = arith.constant 3.906250e-03 : f32
    %3 = vector.broadcast %cst_1 : f32 to vector<8x1xf32>
    %4 = arith.mulf %2, %3 : vector<8x1xf32>
    %c0_2 = arith.constant 0 : index
    %c0_3 = arith.constant 0 : index
    %5 = vector.load %arg2[%c0_2, %c0_3] : memref<8x1xf32, #tpu.memory_space<vmem>>, vector<8x1xf32>
    tpu.vector_store %arg2[%c0_2, %c0_3], %4 {strides = array<i32>} : memref<8x1xf32, #tpu.memory_space<vmem>>, vector<8x1xf32>,
    return
  }
  func.func @transform_0(%arg0: i32) -> (i32, i32) {
    %c0_i32 = arith.constant 0 : i32
    %c0_i32_0 = arith.constant 0 : i32
    return %arg0, %c0_i32 : i32, i32
  }
  func.func @transform_1(%arg0: i32) -> (i32, i32) {
    %c0_i32 = arith.constant 0 : i32
    %c0_i32_0 = arith.constant 0 : i32
    return %arg0, %c0_i32 : i32, i32
  }
}

</mosaic_0001>

<bundles_post_ra>
// kernel: tpu_custom_call.1
= control target key start
LH: loop header
LB: loop body
LE: loop exit
PB: predicated region body
PF: predicated region fallthrough
CT: control target
= control target key end

     0   :  { %6 = vsyncpa [#allocation3], 0  ;;  %s62_s9 = smov [#allocation2]   ;;  %s79_s0 = inlined_call_operand.hbm [shape: f32[8,256], index: 0, kind: input, shape index: {}]   ;;  %s80_s1 = inlined_call_operand.vmem [shape: f32[8,1], index: 1, kind: output, shape index: {}]  }
   0x1   :  { %s12_s8 = sshll.u32 %s79_s0, 4  ;;  %s14_s10 = sshll.u32 %s62_s9, 4  ;;  %s13_s8 = int_to_ptr.hbm [resolvable:$true] %s12_s8  ;;  %s15_s10 = int_to_ptr.vmem [resolvable:$true] %s14_s10 }
   0x2   :  { %17 = dma.hbm_to_vmem [thread:$0]  %s13_s8, 256, %s15_s10, [#allocation3]  }
   0x3   :  { %60 = dma.done.wait [#allocation3], 256  }
   0x4   :  { %61 = vsyncadd [#allocation3], 4294967040  ;;  %v22_v0 = vld [vmem:[#allocation2] sm:$0xff]  ;;  %v23_v1 = vld [vmem:[#allocation2 + $0x8] sm:$0xff]  ;;  %vm28_vm0 = vcmask 7168  }
   0x5   :  { %v24_v2 = vadd.f32 %v23_v1, %v22_v0 }
   0x7   :  { %25 = vadd.xlane.f32.xlu0 %v24_v2 }
  0x7a   :  { %v26_v3 = vpop.xlane.xlu0 %25 }
  0x7b   :  { %v27_v4 = vmul.f32 0.00390625, %v26_v3 }
  0x7d   :  { %29 = vst.msk [vmem:[%s80_s1] sm:$0xff] %vm28_vm0, %v27_v4 }
  0x7e   :  { %34 = vsyncpa [#allocation3], 1 }

</bundles_post_ra>
